<compile_context>
chip_gen: v6e
topology: v6e:2x2x1
jax: 0.10.0
libtpu: 0.0.40
codegen_flags: <defaults>
</compile_context>

<pallas_src>
import jax
import jax.numpy as jnp
from jax.experimental import pallas as pl
from jax.experimental.pallas import tpu as pltpu


def _round_up(x, m):
    return ((x + m - 1) // m) * m


def _linear_kernel(z_ref, w_ref, b_ref, o_ref, acc_ref):
    # grid = (N tiles, K tiles); K is the last ("arbitrary") axis.
    k = pl.program_id(1)

    @pl.when(k == 0)
    def _():
        acc_ref[...] = jnp.zeros_like(acc_ref)

    # bf16 x bf16 -> f32 accumulate on the MXU.
    acc_ref[...] += jnp.dot(
        z_ref[...], w_ref[...], preferred_element_type=jnp.float32)

    @pl.when(k == pl.num_programs(1) - 1)
    def _():
        o_ref[...] = (acc_ref[...] + b_ref[...]).astype(o_ref.dtype)


def cont_feat_matrix_forward(z, w_t, bias, num_obs, num_feats,
                             *, tn_max=512, tk_max=512):
    """z: (B, num_obs) f32, w_t: (num_obs, num_obs*num_feats) f32 (pre-transposed
    nn.Linear weight), bias: (num_obs*num_feats,) f32.
    Returns f32 (B, num_obs, num_feats)."""
    batch, k_dim = z.shape
    n_dim = num_obs * num_feats
    assert w_t.shape == (k_dim, n_dim) and bias.shape == (n_dim,)

    # --- TPU-friendly padded shapes ------------------------------------
    b_pad = _round_up(batch, 16)                 # full bf16 sublane group
    tn = min(tn_max, _round_up(n_dim, 128))      # lane-dense output tile
    n_pad = _round_up(n_dim, tn)
    if k_dim > tk_max:                           # only tile K when it is large
        tk = tk_max
        k_pad = _round_up(k_dim, tk)
    else:
        tk = k_dim
        k_pad = k_dim
    nt = n_pad // tn
    kt = k_pad // tk

    # bf16 inputs halve the dominant HBM stream (W); zero-padding is exact.
    z_p = jnp.pad(z.astype(jnp.bfloat16),
                  ((0, b_pad - batch), (0, k_pad - k_dim)))
    w_p = jnp.pad(w_t.astype(jnp.bfloat16),
                  ((0, k_pad - k_dim), (0, n_pad - n_dim)))
    b_p = jnp.pad(bias.astype(jnp.float32), (0, n_pad - n_dim)).reshape(1, n_pad)

    cost = pl.CostEstimate(
        flops=2 * b_pad * k_pad * n_pad,
        transcendentals=0,
        bytes_accessed=(z_p.size * 2 + w_p.size * 2
                        + b_p.size * 4 + b_pad * n_pad * 4),
    )

    x2d = pl.pallas_call(
        _linear_kernel,
        out_shape=jax.ShapeDtypeStruct((b_pad, n_pad), jnp.float32),
        grid=(nt, kt),
        in_specs=[
            pl.BlockSpec((b_pad, tk), lambda j, k: (0, k)),   # Z
            pl.BlockSpec((tk, tn), lambda j, k: (k, j)),      # W (streamed)
            pl.BlockSpec((1, tn), lambda j, k: (0, j)),       # bias
        ],
        out_specs=pl.BlockSpec((b_pad, tn), lambda j, k: (0, j)),
        scratch_shapes=[pltpu.VMEM((b_pad, tn), jnp.float32)],
        compiler_params=pltpu.CompilerParams(
            dimension_semantics=("parallel", "arbitrary")),
        cost_estimate=cost,
    )(z_p, w_p, b_p)

    # Glue: strip padding, then the view(batch, num_obs, num_feats).
    return x2d[:batch, :n_dim].reshape(batch, num_obs, num_feats)


if __name__ == "__main__":
    # Small shapes consistent with the module.
    batch_size = 2
    num_obs = 8
    num_feats = 4
    out_dim = num_obs * num_feats

    key = jax.random.PRNGKey(0)
    k_w, k_b, k_z = jax.random.split(key, 3)

    # Deterministic parameter init mimicking nn.Linear's default:
    # U(-1/sqrt(in_features), 1/sqrt(in_features)).
    bound = 1.0 / jnp.sqrt(jnp.float32(num_obs))
    # PyTorch weight is (out, in); store transposed (in, out) for the kernel.
    w_t = jax.random.uniform(
        k_w, (num_obs, out_dim), jnp.float32, minval=-bound, maxval=bound)
    bias = jax.random.uniform(
        k_b, (out_dim,), jnp.float32, minval=-bound, maxval=bound)

    # Z ~ standard normal, sampled in plain JAX (glue), consumed by the kernel.
    z = jax.random.normal(k_z, (batch_size, num_obs), jnp.float32)

    x = cont_feat_matrix_forward(z, w_t, bias, num_obs, num_feats)
    x = jax.block_until_ready(x)

    # Reference check (f32 reference; tolerance loosened for bf16 inputs).
    x_ref = (z @ w_t + bias).reshape(batch_size, num_obs, num_feats)
    assert x.shape == (batch_size, num_obs, num_feats)
    assert jnp.allclose(x, x_ref, atol=5e-2, rtol=5e-2)

    # Second small check that exercises multiple lane-dense N tiles + padding.
    no2, nf2, b2 = 32, 20, 4
    od2 = no2 * nf2
    k_w2, k_b2, k_z2 = jax.random.split(jax.random.PRNGKey(1), 3)
    bound2 = 1.0 / jnp.sqrt(jnp.float32(no2))
    w2 = jax.random.uniform(k_w2, (no2, od2), jnp.float32,
                            minval=-bound2, maxval=bound2)
    bias2 = jax.random.uniform(k_b2, (od2,), jnp.float32,
                               minval=-bound2, maxval=bound2)
    z2 = jax.random.normal(k_z2, (b2, no2), jnp.float32)
    x2 = jax.block_until_ready(
        cont_feat_matrix_forward(z2, w2, bias2, no2, nf2))
    x2_ref = (z2 @ w2 + bias2).reshape(b2, no2, nf2)
    assert jnp.allclose(x2, x2_ref, atol=5e-2, rtol=5e-2)

    print("KERNEL_OK")
</pallas_src>

<mosaic_0001>
module attributes {stable_mosaic.version = 11 : i64} {
  func.func @_linear_kernel(%arg0: i32, %arg1: i32, %arg2: memref<16x8xbf16, #tpu.memory_space<vmem>>, %arg3: memref<8x128xbf16, #tpu.memory_space<vmem>>, %arg4: memref<1x128xf32, #tpu.memory_space<vmem>>, %arg5: memref<16x128xf32, #tpu.memory_space<vmem>>, %arg6: memref<16x128xf32, #tpu.memory_space<vmem>>) attributes {dimension_semantics = [#tpu.dimension_semantics<parallel>, #tpu.dimension_semantics<arbitrary>], iteration_bounds = array<i64: 1, 1>, scalar_prefetch = 0 : i64, scratch_operands = 1 : i64, tpu.core_type = #tpu.core_type<tc>, window_params = [{transform_indices = @transform_0, window_bounds = array<i64: 16, 8>}, {transform_indices = @transform_1, window_bounds = array<i64: 8, 128>}, {transform_indices = @transform_2, window_bounds = array<i64: 1, 128>}, {transform_indices = @transform_3, window_bounds = array<i64: 16, 128>}]} {
    %c0_i32 = arith.constant 0 : i32
    %0 = arith.cmpi eq, %arg1, %c0_i32 : i32
    %1 = arith.extui %0 : i1 to i32
    %c0_i32_0 = arith.constant 0 : i32
    %2 = arith.cmpi ne, %1, %c0_i32_0 : i32
    scf.if %2 {
      %cst_10 = arith.constant 0.000000e+00 : f32
      %12 = vector.broadcast %cst_10 : f32 to vector<16x128xf32>
      %c0_11 = arith.constant 0 : index
      %c0_12 = arith.constant 0 : index
      %13 = vector.load %arg6[%c0_11, %c0_12] : memref<16x128xf32, #tpu.memory_space<vmem>>, vector<16x128xf32>
      tpu.vector_store %arg6[%c0_11, %c0_12], %12 {strides = array<i32>} : memref<16x128xf32, #tpu.memory_space<vmem>>, vector<16x128xf32>,
    } else {
    }
    %c0 = arith.constant 0 : index
    %c0_1 = arith.constant 0 : index
    %3 = vector.load %arg6[%c0, %c0_1] : memref<16x128xf32, #tpu.memory_space<vmem>>, vector<16x128xf32>
    %c0_2 = arith.constant 0 : index
    %c0_3 = arith.constant 0 : index
    %4 = vector.load %arg2[%c0_2, %c0_3] : memref<16x8xbf16, #tpu.memory_space<vmem>>, vector<16x8xbf16>
    %c0_4 = arith.constant 0 : index
    %c0_5 = arith.constant 0 : index
    %5 = vector.load %arg3[%c0_4, %c0_5] : memref<8x128xbf16, #tpu.memory_space<vmem>>, vector<8x128xbf16>
    %cst = arith.constant dense<0.000000e+00> : vector<16x128xf32>
    %6 = tpu.matmul %4, %5, %cst {dimension_numbers = #tpu.dot_dimension_numbers<[1], [0], [0], [1], [0, 0, 1, 1], [], []>} : vector<16x8xbf16>, vector<8x128xbf16>, vector<16x128xf32> -> vector<16x128xf32>
    %7 = arith.addf %3, %6 : vector<16x128xf32>
    %c0_6 = arith.constant 0 : index
    %c0_7 = arith.constant 0 : index
    %8 = vector.load %arg6[%c0_6, %c0_7] : memref<16x128xf32, #tpu.memory_space<vmem>>, vector<16x128xf32>
    tpu.vector_store %arg6[%c0_6, %c0_7], %7 {strides = array<i32>} : memref<16x128xf32, #tpu.memory_space<vmem>>, vector<16x128xf32>,
    %c0_i32_8 = arith.constant 0 : i32
    %9 = arith.cmpi eq, %arg1, %c0_i32_8 : i32
    %10 = arith.extui %9 : i1 to i32
    %c0_i32_9 = arith.constant 0 : i32
    %11 = arith.cmpi ne, %10, %c0_i32_9 : i32
    scf.if %11 {
      %c0_10 = arith.constant 0 : index
      %c0_11 = arith.constant 0 : index
      %12 = vector.load %arg6[%c0_10, %c0_11] : memref<16x128xf32, #tpu.memory_space<vmem>>, vector<16x128xf32>
      %c0_12 = arith.constant 0 : index
      %c0_13 = arith.constant 0 : index
      %13 = vector.load %arg4[%c0_12, %c0_13] : memref<1x128xf32, #tpu.memory_space<vmem>>, vector<1x128xf32>
      %14 = vector.broadcast %13 : vector<1x128xf32> to vector<16x128xf32>
      %15 = arith.addf %12, %14 : vector<16x128xf32>
      %c0_14 = arith.constant 0 : index
      %c0_15 = arith.constant 0 : index
      %16 = vector.load %arg5[%c0_14, %c0_15] : memref<16x128xf32, #tpu.memory_space<vmem>>, vector<16x128xf32>
      tpu.vector_store %arg5[%c0_14, %c0_15], %15 {strides = array<i32>} : memref<16x128xf32, #tpu.memory_space<vmem>>, vector<16x128xf32>,
    } else {
    }
    return
  }
  func.func @transform_0(%arg0: i32, %arg1: i32) -> (i32, i32) {
    %c0_i32 = arith.constant 0 : i32
    %c0_i32_0 = arith.constant 0 : i32
    return %c0_i32, %arg1 : i32, i32
  }
  func.func @transform_1(%arg0: i32, %arg1: i32) -> (i32, i32) {
    %c0_i32 = arith.constant 0 : i32
    return %arg1, %arg0 : i32, i32
  }
  func.func @transform_2(%arg0: i32, %arg1: i32) -> (i32, i32) {
    %c0_i32 = arith.constant 0 : i32
    %c0_i32_0 = arith.constant 0 : i32
    return %c0_i32, %arg0 : i32, i32
  }
  func.func @transform_3(%arg0: i32, %arg1: i32) -> (i32, i32) {
    %c0_i32 = arith.constant 0 : i32
    %c0_i32_0 = arith.constant 0 : i32
    return %c0_i32, %arg0 : i32, i32
  }
}

</mosaic_0001>

<bundles_post_ra>
// kernel: tpu_custom_call.1
= control target key start
LH: loop header
LB: loop body
LE: loop exit
PB: predicated region body
PF: predicated region fallthrough
CT: control target
= control target key end

     0   :  { %vm36_vm0 = vcmask 1043456   ;;  %v156_v1 = vmov 0.0   ;;  %vm157_vm1 = vmmov 0   ;;  %vm32_vm2 = vcmask 64512   ;;  %s193_s0 = inlined_call_operand.vmem [shape: bf16[16,8], index: 0, kind: input, shape index: {}]   ;;  %s194_s1 = inlined_call_operand.vmem [shape: bf16[8,128], index: 1, kind: input, shape index: {}]   ;;  %s195_s2 = inlined_call_operand.vmem [shape: f32[1,128], index: 2, kind: input, shape index: {}]   ;;  %s196_s3 = inlined_call_operand.hbm [shape: f32[16,128], index: 3, kind: output, shape index: {}]  }
   0x1   :  { %v26_v0 = vld [vmem:[%s194_s1] sm:$0xf]  ;;  %122 = vmatprep.subr.bf16.mxu0 %v156_v1  ;;  %124 = vmatprep.mubr.msk.bf16.mxu0 %vm157_vm1, %v156_v1 }
   0x2   :  { %v38_v2 = vsel %vm36_vm0, %v26_v0, 0  ;;  %v133_v3 = vld [vmem:[%s193_s0] sm:$0xff]  }
   0x3   :  { %123 = vmatpush3.bf16.msra.mxu0 %v38_v2 }
   0x4   :  { %8 = vsyncpa [#allocation4], 0  ;;  %v119_v4 = vld [vmem:[%s195_s2] ss:$0 sm:$0xff]  ;;  %s158_s1 = smov [#allocation3]  }
   0x5   :  { %s106_s18 = sshll.u32 %s158_s1, 4  ;;  %s107_s18 = int_to_ptr.vmem [resolvable:$true] %s106_s18 }
   0x6   :  { %125 = vmatmul.mubr.msk.bf16.vlgmr.msra.gmra.mxu0 %vm32_vm2, %v133_v3  ;;  %s134_s0 = scalar_lea.vmem %s107_s18, 256  ;;  %p139_p1 = scmp.lt.s32.totalorder %s107_s18, %s107_s18 }
   0x7   :  { %p135_p0 = scmp.ne.s32.totalorder %s107_s18, %s134_s0  ;;  %p140_p2 = scmp.lt.s32.totalorder %s134_s0, %s134_s0 }
   0x9   :  { %p141_p3 = por %p140_p2, %p139_p1 }
   0xb   :  { %p142_p4 = pnand %p141_p3, %p135_p0 }
  0xc6   :  { %v74_v5 = vpop.f32.mrf.mxu0 }
  0xc7   :  { %v97_v6 = vadd.f32 %v119_v4, %v74_v5 }
  0xc8   :  { %v126_v7 = vpop.f32.mrf.mxu0 }
  0xc9   :  { %99 = vst [vmem:[#allocation3] sm:$0xff] %v97_v6 }
  0xca   :  { %v77_v8 = vpop.f32.mrf.mxu0 }
  0xcb   :  { %v98_v9 = vadd.f32 %v119_v4, %v77_v8 }
  0xcc   :  { %v127_v10 = vpop.f32.mrf.mxu0 }
  0xcd   :  { %100 = vst [vmem:[#allocation3 + $0x8] sm:$0xff] %v98_v9 }
  0xce   :  { %145 = shalt.err (!%p142_p4)
}
  0xcf   :  { %s159_s19 = smov 128   ;;  %s160_s2 = smov 8  }
  0xd0   :  { %112 = dma.vmem_to_hbm [thread:$0]  %s107_s18, 256, %s196_s3, [#allocation4], %s159_s19, %s159_s19, %s160_s2  }
  0xd1   :  { %154 = dma.done.wait [#allocation4], 256  }
  0xd2   :  { %155 = vsyncadd [#allocation4], 4294967040 }
  0xd3   :  { %116 = vsyncpa [#allocation4], 1 }

</bundles_post_ra>
